<compile_context>
chip_gen: v5e
topology: v5e:2x2
jax: 0.10.0
libtpu: 0.0.40
codegen_flags: <defaults>
</compile_context>

<pallas_src>
import functools
import math

import jax
import jax.numpy as jnp
from jax import lax
from jax.experimental import pallas as pl
from jax.experimental.pallas import tpu as pltpu

_N_SLOTS = 8  # outstanding row DMAs in the HBM-gather fallback path


def _round_up(x, m):
    return ((x + m - 1) // m) * m


def _tpu_vmem_capacity_bytes():
    """Per-core physical VMEM (128 MiB v5e/v6e, 64 MiB v7x); conservative fallback."""
    try:
        return int(pltpu.get_tpu_info().vmem_capacity_bytes)
    except Exception:
        return 64 << 20


# ----------------------------------------------------------------------------
# Kernels
# ----------------------------------------------------------------------------
def _embed_onehot_kernel(ids_ref, table_ref, out_ref, *, scale, vocab):
    """Resident table, small vocab: gather as one_hot(ids) @ table on the MXU."""
    ids = ids_ref[...]                                       # (t_tile, 1) int32, VMEM
    t_tile = ids.shape[0]
    iota = lax.broadcasted_iota(jnp.int32, (t_tile, vocab), 1)
    onehot = (ids == iota).astype(table_ref.dtype)           # exact 0/1 rows
    acc = jnp.dot(onehot, table_ref[...], preferred_element_type=jnp.float32)
    out_ref[...] = (acc * scale).astype(out_ref.dtype)       # scale in f32, then cast


def _embed_resident_gather_kernel(ids_ref, table_ref, out_ref, stage_ref, *,
                                  scale, t_tile):
    """Resident table, larger vocab: stage 8 rows (scaled in f32) then issue one
    dense (8, d_model) store per group instead of per-token masked stores."""
    def group(g, carry):
        base = pl.multiple_of(g * 8, 8)
        for r in range(8):                                   # unrolled
            row = ids_ref[base + r]                          # SMEM scalar read
            stage_ref[pl.ds(r, 1), :] = table_ref[pl.ds(row, 1), :]
        out_ref[pl.ds(base, 8), :] = (
            stage_ref[...].astype(jnp.float32) * scale).astype(out_ref.dtype)
        return carry

    lax.fori_loop(0, t_tile // 8, group, 0)


def _embed_hbm_gather_kernel(ids_ref, table_hbm, out_ref, *scratch,
                             scale, t_tile, n_slots):
    """Huge vocab: per-row HBM DMAs with n_slots in flight, landing directly in
    the output tile (or a same-dtype staging tile), then one dense scale pass."""
    if len(scratch) == 2:                 # out dtype != table dtype -> stage first
        stage_ref, sem = scratch
        dst = stage_ref
    else:
        (sem,) = scratch
        stage_ref = None
        dst = out_ref

    def row_copy(t, row):
        return pltpu.make_async_copy(
            table_hbm.at[pl.ds(row, 1), :],
            dst.at[pl.ds(t, 1), :],
            sem.at[t % n_slots])

    # Prime the DMA window.
    for s in range(min(n_slots, t_tile)):
        row_copy(s, ids_ref[s]).start()

    def body(t, carry):
        # Read ids BEFORE the wait: DMA .wait() breaks SMEM sst->sld forwarding.
        row_t = ids_ref[t]
        t_next = t + n_slots
        row_next = ids_ref[jnp.minimum(t_next, t_tile - 1)]
        # Reconstruct the *identical* descriptor that was started for row t.
        row_copy(t, row_t).wait()

        @pl.when(t_next < t_tile)
        def _():
            row_copy(t_next, row_next).start()

        return carry

    lax.fori_loop(0, t_tile, body, 0)

    src = out_ref[...] if stage_ref is None else stage_ref[...]
    out_ref[...] = (src.astype(jnp.float32) * scale).astype(out_ref.dtype)


# ----------------------------------------------------------------------------
# Wrapper
# ----------------------------------------------------------------------------
def embedding_forward(token_ids, emb_table, *,
                      tokens_per_tile=256,
                      out_dtype=None,
                      onehot_vocab_max=4096,
                      vmem_table_budget_bytes=None):
    """Returns emb_table[token_ids] * sqrt(d_model), shape token_ids.shape + (d_model,)."""
    lead_shape = token_ids.shape
    n_tok = int(math.prod(lead_shape)) if lead_shape else 1
    vocab, d_model = emb_table.shape
    table_dtype = jnp.dtype(emb_table.dtype)
    out_dtype = table_dtype if out_dtype is None else jnp.dtype(out_dtype)
    scale = float(math.sqrt(d_model))

    # --- tile geometry -------------------------------------------------------
    t_tile = min(_round_up(tokens_per_tile, 8), _round_up(n_tok, 8))
    if _round_up(n_tok, t_tile) // t_tile < 2 and n_tok > 8:
        # v7x megacore: give the "parallel" grid axis >= 2 steps so both
        # TensorCores get work (each extra step costs only ~0.35us).
        t_tile = max(8, _round_up(-(-n_tok // 2), 8))
    n_pad = _round_up(n_tok, t_tile)
    num_tiles = n_pad // t_tile

    # Clamp ids (VMEM refs have no runtime bounds check) and pad with row 0.
    flat_ids = jnp.clip(token_ids.reshape(-1).astype(jnp.int32), 0, vocab - 1)
    if n_pad != n_tok:
        flat_ids = jnp.pad(flat_ids, (0, n_pad - n_tok))

    # --- path selection (generation-aware VMEM budget) -----------------------
    vmem_cap = _tpu_vmem_capacity_bytes()
    if vmem_table_budget_bytes is None:
        vmem_table_budget_bytes = int(0.65 * vmem_cap)   # ~83MiB v5e/v6e, ~41MiB v7x

    table_bytes = vocab * d_model * table_dtype.itemsize
    out_tile_bytes = t_tile * d_model * out_dtype.itemsize
    use_resident = table_bytes <= vmem_table_budget_bytes
    use_onehot = use_resident and vocab <= onehot_vocab_max

    out_spec = pl.BlockSpec((t_tile, d_model), lambda i: (i, 0))
    out_shape = jax.ShapeDtypeStruct((n_pad, d_model), out_dtype)
    ids_smem_spec = pl.BlockSpec((t_tile,), lambda i: (i,),
                                 memory_space=pltpu.MemorySpace.SMEM)

    if use_onehot:
        # Resident table + MXU one-hot gather; ids as a lane-aligned VMEM block.
        kernel = functools.partial(_embed_onehot_kernel, scale=scale, vocab=vocab)
        ids_arg = flat_ids.reshape(n_pad, 1)
        ids_spec = pl.BlockSpec((t_tile, 1), lambda i: (i, 0))
        scratch_shapes = []
        extra_vmem = t_tile * vocab * (table_dtype.itemsize + 4) + (2 << 20)
    elif use_resident:
        # Resident table + 8-row staged gather (dense (8, d_model) stores).
        kernel = functools.partial(_embed_resident_gather_kernel,
                                   scale=scale, t_tile=t_tile)
        ids_arg = flat_ids
        ids_spec = ids_smem_spec
        scratch_shapes = [pltpu.VMEM((8, d_model), table_dtype)]
        extra_vmem = 8 * d_model * table_dtype.itemsize + (1 << 20)
    else:
        # Huge vocab: manual multi-slot row gather from HBM into the out tile.
        kernel = functools.partial(_embed_hbm_gather_kernel, scale=scale,
                                   t_tile=t_tile, n_slots=_N_SLOTS)
        ids_arg = flat_ids
        ids_spec = ids_smem_spec
        same_dtype = (out_dtype == table_dtype)
        stage = [] if same_dtype else [pltpu.VMEM((t_tile, d_model), table_dtype)]
        scratch_shapes = stage + [pltpu.SemaphoreType.DMA((_N_SLOTS,))]
        extra_vmem = (0 if same_dtype
                      else t_tile * d_model * table_dtype.itemsize) + (1 << 20)

    def _table_spec(single_buffer):
        if not use_resident:
            return pl.BlockSpec(memory_space=pl.ANY)       # raw HBM ref, manual DMA
        if single_buffer:
            # Constant index_map -> the table block never changes; don't waste
            # VMEM double-buffering it (doubles resident vocab on v7x's 64 MiB).
            return pl.BlockSpec((vocab, d_model), lambda i: (0, 0),
                                pipeline_mode=pl.Buffered(1))
        return pl.BlockSpec((vocab, d_model), lambda i: (0, 0))

    def _run(single_buffer):
        need = 2 * out_tile_bytes + extra_vmem
        if use_resident:
            need += table_bytes * (1 if single_buffer else 2)
        vmem_limit = int(min(max(need + (4 << 20), 16 << 20),
                             max(vmem_cap - (4 << 20), 16 << 20)))
        grid_spec = pltpu.PrefetchScalarGridSpec(
            num_scalar_prefetch=0,
            grid=(num_tiles,),
            in_specs=[ids_spec, _table_spec(single_buffer)],
            out_specs=out_spec,
            scratch_shapes=scratch_shapes,
        )
        return pl.pallas_call(
            kernel,
            out_shape=out_shape,
            grid_spec=grid_spec,
            compiler_params=pltpu.CompilerParams(
                dimension_semantics=("parallel",),
                vmem_limit_bytes=vmem_limit),
        )(ids_arg, emb_table)

    if use_resident:
        try:
            out_flat = _run(single_buffer=True)
        except Exception:
            # pl.Buffered(1) not supported on this jax version -> default buffering.
            out_flat = _run(single_buffer=False)
    else:
        out_flat = _run(single_buffer=False)

    return out_flat[:n_tok].reshape(*lead_shape, d_model)


# ----------------------------------------------------------------------------
# Demo / self-check
# ----------------------------------------------------------------------------
if __name__ == "__main__":
    vocab = 64
    d_model = 128
    batch, seq = 2, 8

    key = jax.random.PRNGKey(0)
    k_ids, k_emb = jax.random.split(key)

    # Deterministic "parameters": table ~ N(0, 1) like nn.Embedding init.
    emb_table = jax.random.normal(k_emb, (vocab, d_model), dtype=jnp.float32)
    token_ids = jax.random.randint(k_ids, (batch, seq), 0, vocab, dtype=jnp.int32)

    # Reference in plain JAX.
    ref = emb_table[token_ids] * math.sqrt(d_model)

    # 1) Resident table, one-hot MXU gather (default for small vocab).
    out = jax.block_until_ready(embedding_forward(token_ids, emb_table))
    assert out.shape == (batch, seq, d_model)
    assert jnp.allclose(out, ref, atol=1e-4, rtol=1e-4), "one-hot path mismatch"

    # 2) Resident table, 8-row staged gather (force by disabling the one-hot path).
    out_g = jax.block_until_ready(
        embedding_forward(token_ids, emb_table, onehot_vocab_max=0))
    assert jnp.allclose(out_g, ref, atol=1e-4, rtol=1e-4), "staged path mismatch"

    # 3) Large-vocab fallback: manual multi-slot HBM row gather (force via budget=0).
    out_h = jax.block_until_ready(
        embedding_forward(token_ids, emb_table, vmem_table_budget_bytes=0))
    assert jnp.allclose(out_h, ref, atol=1e-4, rtol=1e-4), "HBM-gather path mismatch"

    # 4) bf16 output knob (HBM path exercises the staging + f32-scale-then-cast variant).
    out_bf = jax.block_until_ready(
        embedding_forward(token_ids, emb_table, out_dtype=jnp.bfloat16,
                          vmem_table_budget_bytes=0))
    assert out_bf.dtype == jnp.bfloat16
    assert jnp.allclose(out_bf.astype(jnp.float32), ref, atol=0.25, rtol=2e-2), \
        "bf16 output mismatch"

    print("KERNEL_OK")
</pallas_src>

<mosaic_0001>
module attributes {stable_mosaic.version = 11 : i64} {
  func.func @_embed_onehot_kernel(%arg0: i32, %arg1: memref<8x1xi32, #tpu.memory_space<vmem>>, %arg2: memref<64x128xf32, #tpu.memory_space<vmem>>, %arg3: memref<8x128xf32, #tpu.memory_space<vmem>>) attributes {dimension_semantics = [#tpu.dimension_semantics<parallel>], iteration_bounds = array<i64: 2>, scalar_prefetch = 0 : i64, scratch_operands = 0 : i64, tpu.core_type = #tpu.core_type<tc>, window_params = [{transform_indices = @transform_0, window_bounds = array<i64: 8, 1>}, {pipeline_mode = #tpu.pipeline_mode<synchronous>, transform_indices = @transform_1, window_bounds = array<i64: 64, 128>}, {transform_indices = @transform_2, window_bounds = array<i64: 8, 128>}]} {
    %c0 = arith.constant 0 : index
    %c0_0 = arith.constant 0 : index
    %0 = vector.load %arg1[%c0, %c0_0] : memref<8x1xi32, #tpu.memory_space<vmem>>, vector<8x1xi32>
    %1 = tpu.iota {dimensions = array<i32: 1>} : vector<8x64xi32>
    %2 = vector.broadcast %0 : vector<8x1xi32> to vector<8x64xi32>
    %3 = arith.cmpi eq, %2, %1 : vector<8x64xi32>
    %4 = arith.extui %3 : vector<8x64xi1> to vector<8x64xi32>
    %5 = arith.sitofp %4 : vector<8x64xi32> to vector<8x64xf32>
    %c0_1 = arith.constant 0 : index
    %c0_2 = arith.constant 0 : index
    %6 = vector.load %arg2[%c0_1, %c0_2] : memref<64x128xf32, #tpu.memory_space<vmem>>, vector<64x128xf32>
    %cst = arith.constant dense<0.000000e+00> : vector<8x128xf32>
    %7 = tpu.matmul %5, %6, %cst {dimension_numbers = #tpu.dot_dimension_numbers<[1], [0], [0], [1], [0, 0, 1, 1], [], []>} : vector<8x64xf32>, vector<64x128xf32>, vector<8x128xf32> -> vector<8x128xf32>
    %cst_3 = arith.constant 11.3137083 : f32
    %8 = vector.broadcast %cst_3 : f32 to vector<8x128xf32>
    %9 = arith.mulf %7, %8 : vector<8x128xf32>
    %c0_4 = arith.constant 0 : index
    %c0_5 = arith.constant 0 : index
    %10 = vector.load %arg3[%c0_4, %c0_5] : memref<8x128xf32, #tpu.memory_space<vmem>>, vector<8x128xf32>
    tpu.vector_store %arg3[%c0_4, %c0_5], %9 {strides = array<i32>} : memref<8x128xf32, #tpu.memory_space<vmem>>, vector<8x128xf32>,
    return
  }
  func.func @transform_0(%arg0: i32) -> (i32, i32) {
    %c0_i32 = arith.constant 0 : i32
    %c0_i32_0 = arith.constant 0 : i32
    return %arg0, %c0_i32 : i32, i32
  }
  func.func @transform_1(%arg0: i32) -> (i32, i32) {
    %c0_i32 = arith.constant 0 : i32
    %c0_i32_0 = arith.constant 0 : i32
    %c0_i32_1 = arith.constant 0 : i32
    return %c0_i32, %c0_i32_0 : i32, i32
  }
  func.func @transform_2(%arg0: i32) -> (i32, i32) {
    %c0_i32 = arith.constant 0 : i32
    %c0_i32_0 = arith.constant 0 : i32
    return %arg0, %c0_i32 : i32, i32
  }
}

module attributes {stable_mosaic.version = 11 : i64} {
  func.func @_embed_onehot_kernel(%arg0: i32, %arg1: memref<8x1xi32, #tpu.memory_space<vmem>>, %arg2: memref<64x128xf32, #tpu.memory_space<vmem>>, %arg3: memref<8x128xf32, #tpu.memory_space<vmem>>) attributes {dimension_semantics = [#tpu.dimension_semantics<parallel>], iteration_bounds = array<i64: 2>, scalar_prefetch = 0 : i64, scratch_operands = 0 : i64, tpu.core_type = #tpu.core_type<tc>, window_params = [{transform_indices = @transform_0, window_bounds = array<i64: 8, 1>}, {pipeline_mode = #tpu.pipeline_mode<synchronous>, transform_indices = @transform_1, window_bounds = array<i64: 64, 128>}, {transform_indices = @transform_2, window_bounds = array<i64: 8, 128>}]} {
    %c0 = arith.constant 0 : index
    %c0_0 = arith.constant 0 : index
    %0 = vector.load %arg1[%c0, %c0_0] : memref<8x1xi32, #tpu.memory_space<vmem>>, vector<8x1xi32>
    %1 = tpu.iota {dimensions = array<i32: 1>} : vector<8x64xi32>
    %2 = vector.broadcast %0 : vector<8x1xi32> to vector<8x64xi32>
    %3 = arith.cmpi eq, %2, %1 : vector<8x64xi32>
    %4 = arith.extui %3 : vector<8x64xi1> to vector<8x64xi32>
    %5 = arith.sitofp %4 : vector<8x64xi32> to vector<8x64xf32>
    %c0_1 = arith.constant 0 : index
    %c0_2 = arith.constant 0 : index
    %6 = vector.load %arg2[%c0_1, %c0_2] : memref<64x128xf32, #tpu.memory_space<vmem>>, vector<64x128xf32>
    %cst = arith.constant dense<0.000000e+00> : vector<8x128xf32>
    %7 = tpu.matmul %5, %6, %cst {dimension_numbers = #tpu.dot_dimension_numbers<[1], [0], [0], [1], [0, 0, 1, 1], [], []>} : vector<8x64xf32>, vector<64x128xf32>, vector<8x128xf32> -> vector<8x128xf32>
    %cst_3 = arith.constant 11.3137083 : f32
    %8 = vector.broadcast %cst_3 : f32 to vector<8x128xf32>
    %9 = arith.mulf %7, %8 : vector<8x128xf32>
    %c0_4 = arith.constant 0 : index
    %c0_5 = arith.constant 0 : index
    %10 = vector.load %arg3[%c0_4, %c0_5] : memref<8x128xf32, #tpu.memory_space<vmem>>, vector<8x128xf32>
    tpu.vector_store %arg3[%c0_4, %c0_5], %9 {strides = array<i32>} : memref<8x128xf32, #tpu.memory_space<vmem>>, vector<8x128xf32>,
    return
  }
  func.func @transform_0(%arg0: i32) -> (i32, i32) {
    %c0_i32 = arith.constant 0 : i32
    %c0_i32_0 = arith.constant 0 : i32
    return %arg0, %c0_i32 : i32, i32
  }
  func.func @transform_1(%arg0: i32) -> (i32, i32) {
    %c0_i32 = arith.constant 0 : i32
    %c0_i32_0 = arith.constant 0 : i32
    %c0_i32_1 = arith.constant 0 : i32
    return %c0_i32, %c0_i32_0 : i32, i32
  }
  func.func @transform_2(%arg0: i32) -> (i32, i32) {
    %c0_i32 = arith.constant 0 : i32
    %c0_i32_0 = arith.constant 0 : i32
    return %arg0, %c0_i32 : i32, i32
  }
}

</mosaic_0001>

<bundles_post_ra>
// kernel: tpu_custom_call.1
= control target key start
LH: loop header
LB: loop body
LE: loop exit
PB: predicated region body
PF: predicated region fallthrough
CT: control target
= control target key end

     0   :  { %7 = vsyncpa [#allocation3], 0  ;;  %s568_s0 = inlined_call_operand.vmem [shape: s32[16,1], index: 0, kind: input, shape index: {}]   ;;  %s569_s1 = inlined_call_operand.hbm [shape: f32[64,128], index: 1, kind: input, shape index: {}]   ;;  %s570_s2 = inlined_call_operand.hbm [shape: f32[16,128], index: 2, kind: output, shape index: {}]  }
   0x1   :  { %8 = vsyncpa [#allocation4], 0 }
   0x2   :  { %10 = vsyncpa [#allocation4 + $0x1], 0  ;;  %s473_s9 = smov 0   ;;  %s475_s10 = smov 0  }
   0x3   :  { %s477_s11 = smov 0   ;;  %s479_s12 = smov 0  }
   0x4 LB: > { %s494_s13 = sadd.s32 4294967295, %s451_s12   ;;  %s286_s14 = sadd.s32 4294967294, %s451_s12   ;;  %s451_s12 = sphi %s479_s12, %s576_s12   ;;  %s447_s11 = sphi %s477_s11, %s575_s11   ;;  %s443_s10 = sphi %s475_s10, %s574_s10   ;;  %s439_s9 = sphi %s473_s9, %s573_s9  }
   0x5   : > { %s498_s15 = sadd.s32 1, %s451_s12   ;;  %s70_s16 = sadd.s32 1, %s447_s11 }
   0x6   : > { %s67_s17 = ssub.s32 %s451_s12, %s498_s15  ;;  %p80_p0 = scmp.ne.s32.totalorder %s447_s11, %s443_s10 }
   0x7   : > { %p68_p1 = scmp.eq.s32.totalorder %s67_s17, 0  ;;  %p81_p2 = scmp.eq.s32.totalorder %s494_s13, 1 }
   0x8   : > { %p86_p3 = scmp.ne.s32.totalorder %s443_s10, %s439_s9  ;;  %p87_p4 = scmp.eq.s32.totalorder %s286_s14, 1 }
   0x9   : > { %s509_s18 = scalar_select %p68_p1, %s447_s11, %s70_s16  }
   0xa   : > { %p511_p5 = por %p81_p2, %p80_p0  ;;  %p515_p6 = por %p87_p4, %p86_p3 }
   0xb   : > { %p287_p7 = scmp.ge.s32.totalorder %s451_s12, 1  ;;  %p94_p8 = scmp.lt.s32.totalorder %s451_s12, 3 }
   0xc   : > { %p314_p9 = scmp.eq.s32.totalorder %s494_s13, 0  ;;  %s105_s23 = sshll.u32 %s569_s1, 4  ;;  %s106_s23 = int_to_ptr.hbm [resolvable:$true] %s105_s23 }
   0xd   : > { %p95_p10 = pnand %p287_p7, %p94_p8  ;;  %s453_s24 = smov [#allocation2]  }
   0xe   : > { %s107_s25 = sshll.u32 %s453_s24, 4  ;;  %s454_s26 = smov 128   ;;  %s108_s25 = int_to_ptr.vmem [resolvable:$true] %s107_s25 }
   0xf   : > { %p306_p11 = pneg %p95_p10  ;;  %s455_s27 = smov 8  }
  0x10   : > { %130 = sbr.rel (%p95_p10) target bundleno = 277 (0x115), region = 28 }
  0x11   : > { %p307_p12 = pnand %p314_p9, %p306_p11 }
  0x13   : > { %309 = dma.hbm_to_vmem [thread:$0]  (!%p307_p12), %s106_s23, 1024, %s108_s25, [#allocation3], %s454_s26, %s454_s26, %s455_s27  }
  0x15   : > { %430 = dma.done.wait (%p314_p9), [#allocation3], 1024  }
  0x16   : > { %432 = vsyncadd (%p314_p9), [#allocation3], 4294966272  ;;  %p152_p13 = scmp.lt.s32.totalorder %s494_s13, 1  ;;  %v456_v0 = vmov 0   ;;  %v172_v2 = vld [vmem:[#allocation2 + $0x38] sm:$0xff]  ;;  %v171_v3 = vld [vmem:[#allocation2 + $0x30] sm:$0xff]  ;;  %v157_v10 = vlaneseq }
  0x17   : > { %354 = vset.pattern.permute.xlu0 %v456_v0  ;;  %185 = vmatpush.msra.mxu0 %v172_v2  ;;  %v170_v4 = vld [vmem:[#allocation2 + $0x28] sm:$0xff]  ;;  %v169_v5 = vld [vmem:[#allocation2 + $0x20] sm:$0xff]  ;;  %v168_v6 = vld [vmem:[#allocation2 + $0x18] sm:$0xff]  ;;  %vm173_vm0 = vcmask 523264   ;;  %v457_v13 = vmov 0.0   ;;  %s149_s5 = sand.u32 1, %s443_s10  }
  0x18   : > { %s153_s28 = scalar_select %p152_p13, %s494_s13, 1  ;;  %v167_v7 = vld [vmem:[#allocation2 + $0x10] sm:$0xff]  ;;  %v166_v8 = vld [vmem:[#allocation2 + $0x8] sm:$0xff]  ;;  %v165_v9 = vld [vmem:[#allocation2] sm:$0xff]  ;;  %v158_v11 = vand.u32 127, %v157_v10 }
  0x19   : > { %186 = vmatpush.msra.mxu0 %v171_v3  ;;  %s292_s6 = sshll.u32 %s149_s5, 3  ;;  %s297_s7 = sshll.u32 %s494_s13, 3 }
  0x1a   : > { %s293_s29 = sshll.u32 %s153_s28, 3  ;;  %s210_s16 = scalar_lea.hbm %s570_s2, %s297_s7 }
  0x1b   : > { %s155_s4 = scalar_lea.vmem %s568_s0, %s293_s29  ;;  %187 = vmatpush.msra.mxu0 %v170_v4  ;;  %s151_s17 = scalar_lea.vmem [#allocation5], %s292_s6 }
  0x1c   : > { %v156_v1 = vld [vmem:[%s155_s4] sm:$0xff]  ;;  %s212_s21 = sshll.u32 %s151_s17, 4  ;;  %s214_s22 = sshll.u32 %s210_s16, 4  ;;  %s213_s21 = int_to_ptr.vmem [resolvable:$true] %s212_s21  ;;  %s215_s22 = int_to_ptr.hbm [resolvable:$true] %s214_s22 }
  0x1d   : > { %160 = vperm.xlu0 %354, %v156_v1   ;;  %188 = vmatpush.msra.mxu0 %v169_v5  ;;  %s200_s23 = scalar_lea.sflag [#allocation4], %s149_s5  ;;  %s399_s24 = sshra.s32 %s215_s22, 4  ;;  %s400_s24 = int_to_ptr.hbm [resolvable:$true] %s399_s24 }
  0x1e   : > { %s401_s25 = scalar_lea.hbm %s400_s24, 8  ;;  %s405_s27 = scalar_lea.hbm %s570_s2, 16 }
  0x1f   : > { %189 = vmatpush.msra.mxu0 %v168_v6  ;;  %p402_p0 = scmp.ne.s32.totalorder %s400_s24, %s401_s25  ;;  %p406_p3 = scmp.lt.s32.totalorder %s400_s24, %s570_s2 }
  0x20   : > { %p407_p4 = scmp.lt.s32.totalorder %s405_s27, %s401_s25 }
  0x21   : > { %190 = vmatpush.msra.mxu0 %v167_v7  ;;  %p403_p1 = pnand %p402_p0, %p511_p5 }
  0x22   : > { %p408_p7 = por %p407_p4, %p406_p3 }
  0x23   : > { %191 = vmatpush.msra.mxu0 %v166_v8  ;;  %p404_p2 = pneg %p403_p1 }
  0x25   : > { %192 = vmatpush.msra.mxu0 %v165_v9  ;;  %p409_p8 = pnand %p408_p7, %p404_p2 }
  0x8f   : > { %v161_v12 = vpop.permute.xlu0 %160 }
  0x90   : > { %vm162_vm1 = vcmp.eq.s32.totalorder %v161_v12, %v158_v11 }
  0x91   : > { %v294_v14 = vsel %vm162_vm1, 1.0, %v457_v13 }
  0x92   : > { %295 = vmatmul.msk.f32.vlgmr.msra.gmra.mxu0 %vm173_vm0, %v294_v14 }
 0x10f   : > { %v194_v15 = vpop.f32.mrf.mxu0 }
 0x110   : > { %v197_v16 = vmul.f32 11.313708, %v194_v15 }
 0x112   : > { %198 = vst [vmem:[%s151_s17] sm:$0xff] %v197_v16 }
 0x113   : > { %412 = shalt.err (!%p409_p8)
}
 0x114   : > { %304 = dma.vmem_to_hbm [thread:$0]  (%p511_p5), %s213_s21, 128, %s215_s22, %s200_s23  }
 0x115 PF: > { %p316_p9 = scmp.ge.s32.totalorder %s451_s12, 2  ;;  %s226_s30 = sand.u32 1, %s439_s9  }
 0x116   : > { %s227_s3 = scalar_lea.sflag [#allocation4], %s226_s30 }
 0x117   : > { %p311_p10 = pnand %p316_p9, %p515_p6 }
 0x119   : > { %p312_p11 = pneg %p311_p10 }
 0x11b   : > { %434 = dma.done.wait (%p312_p11), %s227_s3, 128  }
 0x11c   : > { %436 = vsyncadd (%p312_p11), %s227_s3, 4294967168  ;;  %p13_p12 = scmp.ge.s32.totalorder %s498_s15, 4   ;;  %s573_s9 = smov %s443_s10 }
 0x11d   : > { %s574_s10 = smov %s447_s11  ;;  %s575_s11 = smov %s509_s18 }
 0x11e   : > { %s576_s12 = smov %s498_s15  ;;  %15 = sbr.rel (!%p13_p12) target bundleno = 4 (0x4), region = 68 }
 0x123   :  { %233 = vsyncpa [#allocation3], 1 }
 0x124   :  { %235 = vsyncpa [#allocation3 + $0x1], 1 }
 0x125   :  { %236 = vsyncpa [#allocation4], 1 }
 0x126   :  { %238 = vsyncpa [#allocation4 + $0x1], 1 }

// kernel: tpu_custom_call.1
= control target key start
LH: loop header
LB: loop body
LE: loop exit
PB: predicated region body
PF: predicated region fallthrough
CT: control target
= control target key end

     0   :  { %7 = vsyncpa [#allocation3], 0  ;;  %s568_s0 = inlined_call_operand.vmem [shape: s32[16,1], index: 0, kind: input, shape index: {}]   ;;  %s569_s1 = inlined_call_operand.hbm [shape: f32[64,128], index: 1, kind: input, shape index: {}]   ;;  %s570_s2 = inlined_call_operand.hbm [shape: f32[16,128], index: 2, kind: output, shape index: {}]  }
   0x1   :  { %8 = vsyncpa [#allocation4], 0 }
   0x2   :  { %10 = vsyncpa [#allocation4 + $0x1], 0  ;;  %s473_s9 = smov 0   ;;  %s475_s10 = smov 0  }
   0x3   :  { %s477_s11 = smov 0   ;;  %s479_s12 = smov 0  }
   0x4 LB: > { %s494_s13 = sadd.s32 4294967295, %s451_s12   ;;  %s286_s14 = sadd.s32 4294967294, %s451_s12   ;;  %s451_s12 = sphi %s479_s12, %s576_s12   ;;  %s447_s11 = sphi %s477_s11, %s575_s11   ;;  %s443_s10 = sphi %s475_s10, %s574_s10   ;;  %s439_s9 = sphi %s473_s9, %s573_s9  }
   0x5   : > { %s498_s15 = sadd.s32 1, %s451_s12   ;;  %s70_s16 = sadd.s32 1, %s447_s11 }
   0x6   : > { %s67_s17 = ssub.s32 %s451_s12, %s498_s15  ;;  %p80_p0 = scmp.ne.s32.totalorder %s447_s11, %s443_s10 }
   0x7   : > { %p68_p1 = scmp.eq.s32.totalorder %s67_s17, 0  ;;  %p81_p2 = scmp.eq.s32.totalorder %s494_s13, 1 }
   0x8   : > { %p86_p3 = scmp.ne.s32.totalorder %s443_s10, %s439_s9  ;;  %p87_p4 = scmp.eq.s32.totalorder %s286_s14, 1 }
   0x9   : > { %s509_s18 = scalar_select %p68_p1, %s447_s11, %s70_s16  }
   0xa   : > { %p511_p5 = por %p81_p2, %p80_p0  ;;  %p515_p6 = por %p87_p4, %p86_p3 }
   0xb   : > { %p287_p7 = scmp.ge.s32.totalorder %s451_s12, 1  ;;  %p94_p8 = scmp.lt.s32.totalorder %s451_s12, 3 }
   0xc   : > { %p314_p9 = scmp.eq.s32.totalorder %s494_s13, 0  ;;  %s105_s23 = sshll.u32 %s569_s1, 4  ;;  %s106_s23 = int_to_ptr.hbm [resolvable:$true] %s105_s23 }
   0xd   : > { %p95_p10 = pnand %p287_p7, %p94_p8  ;;  %s453_s24 = smov [#allocation2]  }
   0xe   : > { %s107_s25 = sshll.u32 %s453_s24, 4  ;;  %s454_s26 = smov 128   ;;  %s108_s25 = int_to_ptr.vmem [resolvable:$true] %s107_s25 }
   0xf   : > { %p306_p11 = pneg %p95_p10  ;;  %s455_s27 = smov 8  }
  0x10   : > { %130 = sbr.rel (%p95_p10) target bundleno = 277 (0x115), region = 28 }
  0x11   : > { %p307_p12 = pnand %p314_p9, %p306_p11 }
  0x13   : > { %309 = dma.hbm_to_vmem [thread:$0]  (!%p307_p12), %s106_s23, 1024, %s108_s25, [#allocation3], %s454_s26, %s454_s26, %s455_s27  }
  0x15   : > { %430 = dma.done.wait (%p314_p9), [#allocation3], 1024  }
  0x16   : > { %432 = vsyncadd (%p314_p9), [#allocation3], 4294966272  ;;  %p152_p13 = scmp.lt.s32.totalorder %s494_s13, 1  ;;  %v456_v0 = vmov 0   ;;  %v172_v2 = vld [vmem:[#allocation2 + $0x38] sm:$0xff]  ;;  %v171_v3 = vld [vmem:[#allocation2 + $0x30] sm:$0xff]  ;;  %v157_v10 = vlaneseq }
  0x17   : > { %354 = vset.pattern.permute.xlu0 %v456_v0  ;;  %185 = vmatpush.msra.mxu0 %v172_v2  ;;  %v170_v4 = vld [vmem:[#allocation2 + $0x28] sm:$0xff]  ;;  %v169_v5 = vld [vmem:[#allocation2 + $0x20] sm:$0xff]  ;;  %v168_v6 = vld [vmem:[#allocation2 + $0x18] sm:$0xff]  ;;  %vm173_vm0 = vcmask 523264   ;;  %v457_v13 = vmov 0.0   ;;  %s149_s5 = sand.u32 1, %s443_s10  }
  0x18   : > { %s153_s28 = scalar_select %p152_p13, %s494_s13, 1  ;;  %v167_v7 = vld [vmem:[#allocation2 + $0x10] sm:$0xff]  ;;  %v166_v8 = vld [vmem:[#allocation2 + $0x8] sm:$0xff]  ;;  %v165_v9 = vld [vmem:[#allocation2] sm:$0xff]  ;;  %v158_v11 = vand.u32 127, %v157_v10 }
  0x19   : > { %186 = vmatpush.msra.mxu0 %v171_v3  ;;  %s292_s6 = sshll.u32 %s149_s5, 3  ;;  %s297_s7 = sshll.u32 %s494_s13, 3 }
  0x1a   : > { %s293_s29 = sshll.u32 %s153_s28, 3  ;;  %s210_s16 = scalar_lea.hbm %s570_s2, %s297_s7 }
  0x1b   : > { %s155_s4 = scalar_lea.vmem %s568_s0, %s293_s29  ;;  %187 = vmatpush.msra.mxu0 %v170_v4  ;;  %s151_s17 = scalar_lea.vmem [#allocation5], %s292_s6 }
  0x1c   : > { %v156_v1 = vld [vmem:[%s155_s4] sm:$0xff]  ;;  %s212_s21 = sshll.u32 %s151_s17, 4  ;;  %s214_s22 = sshll.u32 %s210_s16, 4  ;;  %s213_s21 = int_to_ptr.vmem [resolvable:$true] %s212_s21  ;;  %s215_s22 = int_to_ptr.hbm [resolvable:$true] %s214_s22 }
  0x1d   : > { %160 = vperm.xlu0 %354, %v156_v1   ;;  %188 = vmatpush.msra.mxu0 %v169_v5  ;;  %s200_s23 = scalar_lea.sflag [#allocation4], %s149_s5  ;;  %s399_s24 = sshra.s32 %s215_s22, 4  ;;  %s400_s24 = int_to_ptr.hbm [resolvable:$true] %s399_s24 }
  0x1e   : > { %s401_s25 = scalar_lea.hbm %s400_s24, 8  ;;  %s405_s27 = scalar_lea.hbm %s570_s2, 16 }
  0x1f   : > { %189 = vmatpush.msra.mxu0 %v168_v6  ;;  %p402_p0 = scmp.ne.s32.totalorder %s400_s24, %s401_s25  ;;  %p406_p3 = scmp.lt.s32.totalorder %s400_s24, %s570_s2 }
  0x20   : > { %p407_p4 = scmp.lt.s32.totalorder %s405_s27, %s401_s25 }
  0x21   : > { %190 = vmatpush.msra.mxu0 %v167_v7  ;;  %p403_p1 = pnand %p402_p0, %p511_p5 }
  0x22   : > { %p408_p7 = por %p407_p4, %p406_p3 }
  0x23   : > { %191 = vmatpush.msra.mxu0 %v166_v8  ;;  %p404_p2 = pneg %p403_p1 }
  0x25   : > { %192 = vmatpush.msra.mxu0 %v165_v9  ;;  %p409_p8 = pnand %p408_p7, %p404_p2 }
  0x8f   : > { %v161_v12 = vpop.permute.xlu0 %160 }
  0x90   : > { %vm162_vm1 = vcmp.eq.s32.totalorder %v161_v12, %v158_v11 }
  0x91   : > { %v294_v14 = vsel %vm162_vm1, 1.0, %v457_v13 }
  0x92   : > { %295 = vmatmul.msk.f32.vlgmr.msra.gmra.mxu0 %vm173_vm0, %v294_v14 }
 0x10f   : > { %v194_v15 = vpop.f32.mrf.mxu0 }
 0x110   : > { %v197_v16 = vmul.f32 11.313708, %v194_v15 }
 0x112   : > { %198 = vst [vmem:[%s151_s17] sm:$0xff] %v197_v16 }
 0x113   : > { %412 = shalt.err (!%p409_p8)
}
 0x114   : > { %304 = dma.vmem_to_hbm [thread:$0]  (%p511_p5), %s213_s21, 128, %s215_s22, %s200_s23  }
 0x115 PF: > { %p316_p9 = scmp.ge.s32.totalorder %s451_s12, 2  ;;  %s226_s30 = sand.u32 1, %s439_s9  }
 0x116   : > { %s227_s3 = scalar_lea.sflag [#allocation4], %s226_s30 }
 0x117   : > { %p311_p10 = pnand %p316_p9, %p515_p6 }
 0x119   : > { %p312_p11 = pneg %p311_p10 }
 0x11b   : > { %434 = dma.done.wait (%p312_p11), %s227_s3, 128  }
 0x11c   : > { %436 = vsyncadd (%p312_p11), %s227_s3, 4294967168  ;;  %p13_p12 = scmp.ge.s32.totalorder %s498_s15, 4   ;;  %s573_s9 = smov %s443_s10 }
 0x11d   : > { %s574_s10 = smov %s447_s11  ;;  %s575_s11 = smov %s509_s18 }
 0x11e   : > { %s576_s12 = smov %s498_s15  ;;  %15 = sbr.rel (!%p13_p12) target bundleno = 4 (0x4), region = 68 }
 0x123   :  { %233 = vsyncpa [#allocation3], 1 }
 0x124   :  { %235 = vsyncpa [#allocation3 + $0x1], 1 }
 0x125   :  { %236 = vsyncpa [#allocation4], 1 }
 0x126   :  { %238 = vsyncpa [#allocation4 + $0x1], 1 }

</bundles_post_ra>
